<compile_context>
chip_gen: v7x
topology: tpu7x:2x2x1
jax: 0.10.0
libtpu: 0.0.40
codegen_flags: <defaults>
</compile_context>

<pallas_src>
import functools

import jax
import jax.numpy as jnp
from jax.experimental import pallas as pl
from jax.experimental.pallas import tpu as pltpu


def _lstm_fc_kernel(x_ref, wih_ref, whh_ref, b_ref, wfc_ref, bfc_ref, o_ref,
                    *, B, T, H):
    # ---- Hoist all weight / bias reads out of the recurrence (read once). ----
    w_ih = wih_ref[...]          # (D, 4H)
    w_hh = whh_ref[...]          # (H, 4H)
    b = b_ref[...]               # (1, 4H)  == b_ih + b_hh
    w_fc = wfc_ref[...]          # (H, A)
    b_fc = bfc_ref[...]          # (1, A)

    # ---- Batched input projection (off the serial chain), time-major rows. ----
    # x_ref is already (T*B, D) time-major, so gx rows for step t are the
    # contiguous sublane block [t*B, (t+1)*B).
    gx = jnp.dot(x_ref[...], w_ih, preferred_element_type=jnp.float32) + b   # (T*B, 4H)

    # ---- Lane constants so one tanh pass yields all four gate activations. ----
    # sigmoid(x) = 0.5 * tanh(0.5 * x) + 0.5  for the i/f/o lanes; g lanes use
    # the plain tanh from the same EUP pass.
    lane = jax.lax.broadcasted_iota(jnp.int32, (1, 4 * H), 1)
    is_g = (lane >= 2 * H) & (lane < 3 * H)
    scale = jnp.where(is_g, 1.0, 0.5).astype(jnp.float32)   # pre- and post-scale
    offset = jnp.where(is_g, 0.0, 0.5).astype(jnp.float32)  # post-offset

    # ---- Serial recurrence, fully unrolled (T small & static). ----
    h = jnp.zeros((B, H), jnp.float32)
    c = jnp.zeros((B, H), jnp.float32)
    hs = []
    for t in range(T):
        gates = gx[t * B:(t + 1) * B, :] + jnp.dot(
            h, w_hh, preferred_element_type=jnp.float32)          # (B, 4H)

        # Single full-vreg tanh; sigmoids derived with VALU scale/offset.
        acts = jnp.tanh(gates * scale) * scale + offset            # (B, 4H)
        i_g = acts[:, 0 * H:1 * H]
        f_g = acts[:, 1 * H:2 * H]
        g_g = acts[:, 2 * H:3 * H]
        o_g = acts[:, 3 * H:4 * H]

        c = f_g * c + i_g * g_g
        h = o_g * jnp.tanh(c)
        hs.append(h)                                               # stays in vregs

    # ---- Batched fc head over all timesteps + one lane-packed 2D store. ----
    h_all = jnp.concatenate(hs, axis=0)                            # (T*B, H) time-major
    y = jnp.dot(h_all, w_fc, preferred_element_type=jnp.float32) + b_fc
    o_ref[...] = y.astype(o_ref.dtype)                             # (T*B, A)


def imitation_lstm_forward(x, params):
    """x: (B, T, D) float32 (batch_first, as in PyTorch). Returns (B, T, A)."""
    B, T, D = x.shape
    w_ih = params["w_ih"]        # (D, 4H)  (pre-transposed vs PyTorch weight_ih_l0)
    w_hh = params["w_hh"]        # (H, 4H)
    b = params["b"]              # (1, 4H)  == b_ih + b_hh
    w_fc = params["w_fc"]        # (H, A)   (pre-transposed vs PyTorch fc.weight)
    b_fc = params["b_fc"]        # (1, A)
    H = w_hh.shape[0]
    A = w_fc.shape[1]

    # Time-major 2D slab so the kernel's per-step slice is a contiguous
    # sublane block (transpose/reshape happen in XLA, outside the kernel).
    x_tm = jnp.transpose(x.astype(jnp.float32), (1, 0, 2)).reshape(T * B, D)

    vmem_spec = pl.BlockSpec(memory_space=pltpu.MemorySpace.VMEM)
    kernel = functools.partial(_lstm_fc_kernel, B=B, T=T, H=H)

    # Single invocation: no grid, every operand lives whole in VMEM.
    # TODO(synk): if batch grows, add a grid over B with
    # dimension_semantics=("parallel",) to use both v7x TensorCores.
    y2d = pl.pallas_call(
        kernel,
        out_shape=jax.ShapeDtypeStruct((T * B, A), jnp.float32),
        in_specs=[vmem_spec] * 6,
        out_specs=vmem_spec,
    )(x_tm, w_ih, w_hh, b, w_fc, b_fc)

    return jnp.transpose(y2d.reshape(T, B, A), (1, 0, 2))          # (B, T, A)


def _reference_forward(x, params):
    """Pure-JAX reference (lax.scan) with identical semantics, for validation."""
    w_ih, w_hh, b = params["w_ih"], params["w_hh"], params["b"]
    w_fc, b_fc = params["w_fc"], params["b_fc"]
    B, T, D = x.shape
    H = w_hh.shape[0]

    def step(carry, x_t):
        h, c = carry
        gates = x_t @ w_ih + h @ w_hh + b[0]
        i = jax.nn.sigmoid(gates[:, 0 * H:1 * H])
        f = jax.nn.sigmoid(gates[:, 1 * H:2 * H])
        g = jnp.tanh(gates[:, 2 * H:3 * H])
        o = jax.nn.sigmoid(gates[:, 3 * H:4 * H])
        c = f * c + i * g
        h = o * jnp.tanh(c)
        return (h, c), h

    h0 = jnp.zeros((B, H), jnp.float32)
    c0 = jnp.zeros((B, H), jnp.float32)
    _, hs = jax.lax.scan(step, (h0, c0), jnp.transpose(x, (1, 0, 2)))  # (T, B, H)
    out = hs @ w_fc + b_fc[0]                                          # (T, B, A)
    return jnp.transpose(out, (1, 0, 2))


def init_params(key, input_dim, hidden_dim, num_actions):
    """Deterministic synthetic params, PyTorch-style uniform(-1/sqrt(H), 1/sqrt(H))."""
    ks = jax.random.split(key, 6)
    bound = 1.0 / jnp.sqrt(jnp.float32(hidden_dim))
    u = lambda k, shape: jax.random.uniform(k, shape, jnp.float32, -bound, bound)
    w_ih = u(ks[0], (input_dim, 4 * hidden_dim))        # = weight_ih_l0.T
    w_hh = u(ks[1], (hidden_dim, 4 * hidden_dim))       # = weight_hh_l0.T
    b_ih = u(ks[2], (4 * hidden_dim,))
    b_hh = u(ks[3], (4 * hidden_dim,))
    w_fc = u(ks[4], (hidden_dim, num_actions))          # = fc.weight.T
    b_fc = u(ks[5], (num_actions,))
    return {
        "w_ih": w_ih,
        "w_hh": w_hh,
        "b": (b_ih + b_hh)[None, :],
        "w_fc": w_fc,
        "b_fc": b_fc[None, :],
    }


if __name__ == "__main__":
    # Small shapes consistent with the module: input_dim=9, hidden_dim=32,
    # num_actions=8, batch=2, seq=8.
    B, T, D, H, A = 2, 8, 9, 32, 8

    key = jax.random.PRNGKey(0)
    k_x, k_p = jax.random.split(key)
    x = jax.random.normal(k_x, (B, T, D), jnp.float32)
    params = init_params(k_p, D, H, A)

    out = jax.block_until_ready(imitation_lstm_forward(x, params))
    ref = jax.block_until_ready(_reference_forward(x, params))

    assert out.shape == (B, T, A), out.shape
    # Tolerance slightly widened vs 2e-5: i/f/o sigmoids are derived from the
    # tanh pass (mathematically identical, rounding differs).
    assert jnp.allclose(out, ref, atol=5e-5, rtol=5e-5), "mismatch vs reference"
    print("KERNEL_OK")
</pallas_src>

<mosaic_0001>
module attributes {stable_mosaic.version = 11 : i64} {
  func.func @_lstm_fc_kernel(%arg0: memref<16x9xf32, #tpu.memory_space<vmem>>, %arg1: memref<9x128xf32, #tpu.memory_space<vmem>>, %arg2: memref<32x128xf32, #tpu.memory_space<vmem>>, %arg3: memref<1x128xf32, #tpu.memory_space<vmem>>, %arg4: memref<32x8xf32, #tpu.memory_space<vmem>>, %arg5: memref<1x8xf32, #tpu.memory_space<vmem>>, %arg6: memref<16x8xf32, #tpu.memory_space<vmem>>) attributes {dimension_semantics = [], scalar_prefetch = 0 : i64, scratch_operands = 0 : i64, tpu.core_type = #tpu.core_type<tc>} {
    %c0 = arith.constant 0 : index
    %c0_0 = arith.constant 0 : index
    %0 = vector.load %arg1[%c0, %c0_0] : memref<9x128xf32, #tpu.memory_space<vmem>>, vector<9x128xf32>
    %c0_1 = arith.constant 0 : index
    %c0_2 = arith.constant 0 : index
    %1 = vector.load %arg2[%c0_1, %c0_2] : memref<32x128xf32, #tpu.memory_space<vmem>>, vector<32x128xf32>
    %c0_3 = arith.constant 0 : index
    %c0_4 = arith.constant 0 : index
    %2 = vector.load %arg3[%c0_3, %c0_4] : memref<1x128xf32, #tpu.memory_space<vmem>>, vector<1x128xf32>
    %c0_5 = arith.constant 0 : index
    %c0_6 = arith.constant 0 : index
    %3 = vector.load %arg4[%c0_5, %c0_6] : memref<32x8xf32, #tpu.memory_space<vmem>>, vector<32x8xf32>
    %c0_7 = arith.constant 0 : index
    %c0_8 = arith.constant 0 : index
    %4 = vector.load %arg5[%c0_7, %c0_8] : memref<1x8xf32, #tpu.memory_space<vmem>>, vector<1x8xf32>
    %c0_9 = arith.constant 0 : index
    %c0_10 = arith.constant 0 : index
    %5 = vector.load %arg0[%c0_9, %c0_10] : memref<16x9xf32, #tpu.memory_space<vmem>>, vector<16x9xf32>
    %cst = arith.constant dense<0.000000e+00> : vector<16x128xf32>
    %6 = tpu.matmul %5, %0, %cst {dimension_numbers = #tpu.dot_dimension_numbers<[1], [0], [0], [1], [0, 0, 1, 1], [], []>} : vector<16x9xf32>, vector<9x128xf32>, vector<16x128xf32> -> vector<16x128xf32>
    %7 = vector.broadcast %2 : vector<1x128xf32> to vector<16x128xf32>
    %8 = arith.addf %6, %7 : vector<16x128xf32>
    %9 = tpu.iota {dimensions = array<i32: 1>} : vector<1x128xi32>
    %c64_i32 = arith.constant 64 : i32
    %10 = vector.broadcast %c64_i32 : i32 to vector<1x128xi32>
    %11 = arith.cmpi sge, %9, %10 : vector<1x128xi32>
    %c96_i32 = arith.constant 96 : i32
    %12 = vector.broadcast %c96_i32 : i32 to vector<1x128xi32>
    %13 = arith.cmpi slt, %9, %12 : vector<1x128xi32>
    %14 = arith.andi %11, %13 : vector<1x128xi1>
    %cst_11 = arith.constant 1.000000e+00 : f32
    %cst_12 = arith.constant 5.000000e-01 : f32
    %15 = vector.broadcast %cst_11 : f32 to vector<1x128xf32>
    %16 = vector.broadcast %cst_12 : f32 to vector<1x128xf32>
    %17 = arith.select %14, %15, %16 : vector<1x128xi1>, vector<1x128xf32>
    %cst_13 = arith.constant 0.000000e+00 : f32
    %cst_14 = arith.constant 5.000000e-01 : f32
    %18 = vector.broadcast %cst_13 : f32 to vector<1x128xf32>
    %19 = vector.broadcast %cst_14 : f32 to vector<1x128xf32>
    %20 = arith.select %14, %18, %19 : vector<1x128xi1>, vector<1x128xf32>
    %cst_15 = arith.constant 0.000000e+00 : f32
    %21 = vector.broadcast %cst_15 : f32 to vector<2x32xf32>
    %cst_16 = arith.constant 0.000000e+00 : f32
    %22 = vector.broadcast %cst_16 : f32 to vector<2x32xf32>
    %23 = vector.extract_strided_slice %8 {offsets = [0, 0], sizes = [2, 128], strides = [1, 1]} : vector<16x128xf32> to vector<2x128xf32>
    %cst_17 = arith.constant dense<0.000000e+00> : vector<2x128xf32>
    %24 = tpu.matmul %21, %1, %cst_17 {dimension_numbers = #tpu.dot_dimension_numbers<[1], [0], [0], [1], [0, 0, 1, 1], [], []>} : vector<2x32xf32>, vector<32x128xf32>, vector<2x128xf32> -> vector<2x128xf32>
    %25 = arith.addf %23, %24 : vector<2x128xf32>
    %26 = vector.broadcast %17 : vector<1x128xf32> to vector<2x128xf32>
    %27 = arith.mulf %25, %26 : vector<2x128xf32>
    %28 = math.tanh %27 : vector<2x128xf32>
    %29 = vector.broadcast %17 : vector<1x128xf32> to vector<2x128xf32>
    %30 = arith.mulf %28, %29 : vector<2x128xf32>
    %31 = vector.broadcast %20 : vector<1x128xf32> to vector<2x128xf32>
    %32 = arith.addf %30, %31 : vector<2x128xf32>
    %33 = vector.extract_strided_slice %32 {offsets = [0, 0], sizes = [2, 32], strides = [1, 1]} : vector<2x128xf32> to vector<2x32xf32>
    %34 = vector.extract_strided_slice %32 {offsets = [0, 32], sizes = [2, 32], strides = [1, 1]} : vector<2x128xf32> to vector<2x32xf32>
    %35 = vector.extract_strided_slice %32 {offsets = [0, 64], sizes = [2, 32], strides = [1, 1]} : vector<2x128xf32> to vector<2x32xf32>
    %36 = vector.extract_strided_slice %32 {offsets = [0, 96], sizes = [2, 32], strides = [1, 1]} : vector<2x128xf32> to vector<2x32xf32>
    %37 = arith.mulf %34, %22 : vector<2x32xf32>
    %38 = arith.mulf %33, %35 : vector<2x32xf32>
    %39 = arith.addf %37, %38 : vector<2x32xf32>
    %40 = math.tanh %39 : vector<2x32xf32>
    %41 = arith.mulf %36, %40 : vector<2x32xf32>
    %42 = vector.extract_strided_slice %8 {offsets = [2, 0], sizes = [2, 128], strides = [1, 1]} : vector<16x128xf32> to vector<2x128xf32>
    %cst_18 = arith.constant dense<0.000000e+00> : vector<2x128xf32>
    %43 = tpu.matmul %41, %1, %cst_18 {dimension_numbers = #tpu.dot_dimension_numbers<[1], [0], [0], [1], [0, 0, 1, 1], [], []>} : vector<2x32xf32>, vector<32x128xf32>, vector<2x128xf32> -> vector<2x128xf32>
    %44 = arith.addf %42, %43 : vector<2x128xf32>
    %45 = vector.broadcast %17 : vector<1x128xf32> to vector<2x128xf32>
    %46 = arith.mulf %44, %45 : vector<2x128xf32>
    %47 = math.tanh %46 : vector<2x128xf32>
    %48 = vector.broadcast %17 : vector<1x128xf32> to vector<2x128xf32>
    %49 = arith.mulf %47, %48 : vector<2x128xf32>
    %50 = vector.broadcast %20 : vector<1x128xf32> to vector<2x128xf32>
    %51 = arith.addf %49, %50 : vector<2x128xf32>
    %52 = vector.extract_strided_slice %51 {offsets = [0, 0], sizes = [2, 32], strides = [1, 1]} : vector<2x128xf32> to vector<2x32xf32>
    %53 = vector.extract_strided_slice %51 {offsets = [0, 32], sizes = [2, 32], strides = [1, 1]} : vector<2x128xf32> to vector<2x32xf32>
    %54 = vector.extract_strided_slice %51 {offsets = [0, 64], sizes = [2, 32], strides = [1, 1]} : vector<2x128xf32> to vector<2x32xf32>
    %55 = vector.extract_strided_slice %51 {offsets = [0, 96], sizes = [2, 32], strides = [1, 1]} : vector<2x128xf32> to vector<2x32xf32>
    %56 = arith.mulf %53, %39 : vector<2x32xf32>
    %57 = arith.mulf %52, %54 : vector<2x32xf32>
    %58 = arith.addf %56, %57 : vector<2x32xf32>
    %59 = math.tanh %58 : vector<2x32xf32>
    %60 = arith.mulf %55, %59 : vector<2x32xf32>
    %61 = vector.extract_strided_slice %8 {offsets = [4, 0], sizes = [2, 128], strides = [1, 1]} : vector<16x128xf32> to vector<2x128xf32>
    %cst_19 = arith.constant dense<0.000000e+00> : vector<2x128xf32>
    %62 = tpu.matmul %60, %1, %cst_19 {dimension_numbers = #tpu.dot_dimension_numbers<[1], [0], [0], [1], [0, 0, 1, 1], [], []>} : vector<2x32xf32>, vector<32x128xf32>, vector<2x128xf32> -> vector<2x128xf32>
    %63 = arith.addf %61, %62 : vector<2x128xf32>
    %64 = vector.broadcast %17 : vector<1x128xf32> to vector<2x128xf32>
    %65 = arith.mulf %63, %64 : vector<2x128xf32>
    %66 = math.tanh %65 : vector<2x128xf32>
    %67 = vector.broadcast %17 : vector<1x128xf32> to vector<2x128xf32>
    %68 = arith.mulf %66, %67 : vector<2x128xf32>
    %69 = vector.broadcast %20 : vector<1x128xf32> to vector<2x128xf32>
    %70 = arith.addf %68, %69 : vector<2x128xf32>
    %71 = vector.extract_strided_slice %70 {offsets = [0, 0], sizes = [2, 32], strides = [1, 1]} : vector<2x128xf32> to vector<2x32xf32>
    %72 = vector.extract_strided_slice %70 {offsets = [0, 32], sizes = [2, 32], strides = [1, 1]} : vector<2x128xf32> to vector<2x32xf32>
    %73 = vector.extract_strided_slice %70 {offsets = [0, 64], sizes = [2, 32], strides = [1, 1]} : vector<2x128xf32> to vector<2x32xf32>
    %74 = vector.extract_strided_slice %70 {offsets = [0, 96], sizes = [2, 32], strides = [1, 1]} : vector<2x128xf32> to vector<2x32xf32>
    %75 = arith.mulf %72, %58 : vector<2x32xf32>
    %76 = arith.mulf %71, %73 : vector<2x32xf32>
    %77 = arith.addf %75, %76 : vector<2x32xf32>
    %78 = math.tanh %77 : vector<2x32xf32>
    %79 = arith.mulf %74, %78 : vector<2x32xf32>
    %80 = vector.extract_strided_slice %8 {offsets = [6, 0], sizes = [2, 128], strides = [1, 1]} : vector<16x128xf32> to vector<2x128xf32>
    %cst_20 = arith.constant dense<0.000000e+00> : vector<2x128xf32>
    %81 = tpu.matmul %79, %1, %cst_20 {dimension_numbers = #tpu.dot_dimension_numbers<[1], [0], [0], [1], [0, 0, 1, 1], [], []>} : vector<2x32xf32>, vector<32x128xf32>, vector<2x128xf32> -> vector<2x128xf32>
    %82 = arith.addf %80, %81 : vector<2x128xf32>
    %83 = vector.broadcast %17 : vector<1x128xf32> to vector<2x128xf32>
    %84 = arith.mulf %82, %83 : vector<2x128xf32>
    %85 = math.tanh %84 : vector<2x128xf32>
    %86 = vector.broadcast %17 : vector<1x128xf32> to vector<2x128xf32>
    %87 = arith.mulf %85, %86 : vector<2x128xf32>
    %88 = vector.broadcast %20 : vector<1x128xf32> to vector<2x128xf32>
    %89 = arith.addf %87, %88 : vector<2x128xf32>
    %90 = vector.extract_strided_slice %89 {offsets = [0, 0], sizes = [2, 32], strides = [1, 1]} : vector<2x128xf32> to vector<2x32xf32>
    %91 = vector.extract_strided_slice %89 {offsets = [0, 32], sizes = [2, 32], strides = [1, 1]} : vector<2x128xf32> to vector<2x32xf32>
    %92 = vector.extract_strided_slice %89 {offsets = [0, 64], sizes = [2, 32], strides = [1, 1]} : vector<2x128xf32> to vector<2x32xf32>
    %93 = vector.extract_strided_slice %89 {offsets = [0, 96], sizes = [2, 32], strides = [1, 1]} : vector<2x128xf32> to vector<2x32xf32>
    %94 = arith.mulf %91, %77 : vector<2x32xf32>
    %95 = arith.mulf %90, %92 : vector<2x32xf32>
    %96 = arith.addf %94, %95 : vector<2x32xf32>
    %97 = math.tanh %96 : vector<2x32xf32>
    %98 = arith.mulf %93, %97 : vector<2x32xf32>
    %99 = vector.extract_strided_slice %8 {offsets = [8, 0], sizes = [2, 128], strides = [1, 1]} : vector<16x128xf32> to vector<2x128xf32>
    %cst_21 = arith.constant dense<0.000000e+00> : vector<2x128xf32>
    %100 = tpu.matmul %98, %1, %cst_21 {dimension_numbers = #tpu.dot_dimension_numbers<[1], [0], [0], [1], [0, 0, 1, 1], [], []>} : vector<2x32xf32>, vector<32x128xf32>, vector<2x128xf32> -> vector<2x128xf32>
    %101 = arith.addf %99, %100 : vector<2x128xf32>
    %102 = vector.broadcast %17 : vector<1x128xf32> to vector<2x128xf32>
    %103 = arith.mulf %101, %102 : vector<2x128xf32>
    %104 = math.tanh %103 : vector<2x128xf32>
    %105 = vector.broadcast %17 : vector<1x128xf32> to vector<2x128xf32>
    %106 = arith.mulf %104, %105 : vector<2x128xf32>
    %107 = vector.broadcast %20 : vector<1x128xf32> to vector<2x128xf32>
    %108 = arith.addf %106, %107 : vector<2x128xf32>
    %109 = vector.extract_strided_slice %108 {offsets = [0, 0], sizes = [2, 32], strides = [1, 1]} : vector<2x128xf32> to vector<2x32xf32>
    %110 = vector.extract_strided_slice %108 {offsets = [0, 32], sizes = [2, 32], strides = [1, 1]} : vector<2x128xf32> to vector<2x32xf32>
    %111 = vector.extract_strided_slice %108 {offsets = [0, 64], sizes = [2, 32], strides = [1, 1]} : vector<2x128xf32> to vector<2x32xf32>
    %112 = vector.extract_strided_slice %108 {offsets = [0, 96], sizes = [2, 32], strides = [1, 1]} : vector<2x128xf32> to vector<2x32xf32>
    %113 = arith.mulf %110, %96 : vector<2x32xf32>
    %114 = arith.mulf %109, %111 : vector<2x32xf32>
    %115 = arith.addf %113, %114 : vector<2x32xf32>
    %116 = math.tanh %115 : vector<2x32xf32>
    %117 = arith.mulf %112, %116 : vector<2x32xf32>
    %118 = vector.extract_strided_slice %8 {offsets = [10, 0], sizes = [2, 128], strides = [1, 1]} : vector<16x128xf32> to vector<2x128xf32>
    %cst_22 = arith.constant dense<0.000000e+00> : vector<2x128xf32>
    %119 = tpu.matmul %117, %1, %cst_22 {dimension_numbers = #tpu.dot_dimension_numbers<[1], [0], [0], [1], [0, 0, 1, 1], [], []>} : vector<2x32xf32>, vector<32x128xf32>, vector<2x128xf32> -> vector<2x128xf32>
    %120 = arith.addf %118, %119 : vector<2x128xf32>
    %121 = vector.broadcast %17 : vector<1x128xf32> to vector<2x128xf32>
    %122 = arith.mulf %120, %121 : vector<2x128xf32>
    %123 = math.tanh %122 : vector<2x128xf32>
    %124 = vector.broadcast %17 : vector<1x128xf32> to vector<2x128xf32>
    %125 = arith.mulf %123, %124 : vector<2x128xf32>
    %126 = vector.broadcast %20 : vector<1x128xf32> to vector<2x128xf32>
    %127 = arith.addf %125, %126 : vector<2x128xf32>
    %128 = vector.extract_strided_slice %127 {offsets = [0, 0], sizes = [2, 32], strides = [1, 1]} : vector<2x128xf32> to vector<2x32xf32>
    %129 = vector.extract_strided_slice %127 {offsets = [0, 32], sizes = [2, 32], strides = [1, 1]} : vector<2x128xf32> to vector<2x32xf32>
    %130 = vector.extract_strided_slice %127 {offsets = [0, 64], sizes = [2, 32], strides = [1, 1]} : vector<2x128xf32> to vector<2x32xf32>
    %131 = vector.extract_strided_slice %127 {offsets = [0, 96], sizes = [2, 32], strides = [1, 1]} : vector<2x128xf32> to vector<2x32xf32>
    %132 = arith.mulf %129, %115 : vector<2x32xf32>
    %133 = arith.mulf %128, %130 : vector<2x32xf32>
    %134 = arith.addf %132, %133 : vector<2x32xf32>
    %135 = math.tanh %134 : vector<2x32xf32>
    %136 = arith.mulf %131, %135 : vector<2x32xf32>
    %137 = vector.extract_strided_slice %8 {offsets = [12, 0], sizes = [2, 128], strides = [1, 1]} : vector<16x128xf32> to vector<2x128xf32>
    %cst_23 = arith.constant dense<0.000000e+00> : vector<2x128xf32>
    %138 = tpu.matmul %136, %1, %cst_23 {dimension_numbers = #tpu.dot_dimension_numbers<[1], [0], [0], [1], [0, 0, 1, 1], [], []>} : vector<2x32xf32>, vector<32x128xf32>, vector<2x128xf32> -> vector<2x128xf32>
    %139 = arith.addf %137, %138 : vector<2x128xf32>
    %140 = vector.broadcast %17 : vector<1x128xf32> to vector<2x128xf32>
    %141 = arith.mulf %139, %140 : vector<2x128xf32>
    %142 = math.tanh %141 : vector<2x128xf32>
    %143 = vector.broadcast %17 : vector<1x128xf32> to vector<2x128xf32>
    %144 = arith.mulf %142, %143 : vector<2x128xf32>
    %145 = vector.broadcast %20 : vector<1x128xf32> to vector<2x128xf32>
    %146 = arith.addf %144, %145 : vector<2x128xf32>
    %147 = vector.extract_strided_slice %146 {offsets = [0, 0], sizes = [2, 32], strides = [1, 1]} : vector<2x128xf32> to vector<2x32xf32>
    %148 = vector.extract_strided_slice %146 {offsets = [0, 32], sizes = [2, 32], strides = [1, 1]} : vector<2x128xf32> to vector<2x32xf32>
    %149 = vector.extract_strided_slice %146 {offsets = [0, 64], sizes = [2, 32], strides = [1, 1]} : vector<2x128xf32> to vector<2x32xf32>
    %150 = vector.extract_strided_slice %146 {offsets = [0, 96], sizes = [2, 32], strides = [1, 1]} : vector<2x128xf32> to vector<2x32xf32>
    %151 = arith.mulf %148, %134 : vector<2x32xf32>
    %152 = arith.mulf %147, %149 : vector<2x32xf32>
    %153 = arith.addf %151, %152 : vector<2x32xf32>
    %154 = math.tanh %153 : vector<2x32xf32>
    %155 = arith.mulf %150, %154 : vector<2x32xf32>
    %156 = vector.extract_strided_slice %8 {offsets = [14, 0], sizes = [2, 128], strides = [1, 1]} : vector<16x128xf32> to vector<2x128xf32>
    %cst_24 = arith.constant dense<0.000000e+00> : vector<2x128xf32>
    %157 = tpu.matmul %155, %1, %cst_24 {dimension_numbers = #tpu.dot_dimension_numbers<[1], [0], [0], [1], [0, 0, 1, 1], [], []>} : vector<2x32xf32>, vector<32x128xf32>, vector<2x128xf32> -> vector<2x128xf32>
    %158 = arith.addf %156, %157 : vector<2x128xf32>
    %159 = vector.broadcast %17 : vector<1x128xf32> to vector<2x128xf32>
    %160 = arith.mulf %158, %159 : vector<2x128xf32>
    %161 = math.tanh %160 : vector<2x128xf32>
    %162 = vector.broadcast %17 : vector<1x128xf32> to vector<2x128xf32>
    %163 = arith.mulf %161, %162 : vector<2x128xf32>
    %164 = vector.broadcast %20 : vector<1x128xf32> to vector<2x128xf32>
    %165 = arith.addf %163, %164 : vector<2x128xf32>
    %166 = vector.extract_strided_slice %165 {offsets = [0, 0], sizes = [2, 32], strides = [1, 1]} : vector<2x128xf32> to vector<2x32xf32>
    %167 = vector.extract_strided_slice %165 {offsets = [0, 32], sizes = [2, 32], strides = [1, 1]} : vector<2x128xf32> to vector<2x32xf32>
    %168 = vector.extract_strided_slice %165 {offsets = [0, 64], sizes = [2, 32], strides = [1, 1]} : vector<2x128xf32> to vector<2x32xf32>
    %169 = vector.extract_strided_slice %165 {offsets = [0, 96], sizes = [2, 32], strides = [1, 1]} : vector<2x128xf32> to vector<2x32xf32>
    %170 = arith.mulf %167, %153 : vector<2x32xf32>
    %171 = arith.mulf %166, %168 : vector<2x32xf32>
    %172 = arith.addf %170, %171 : vector<2x32xf32>
    %173 = math.tanh %172 : vector<2x32xf32>
    %174 = arith.mulf %169, %173 : vector<2x32xf32>
    %175 = tpu.concatenate %41, %60, %79, %98, %117, %136, %155, %174 in 0 : vector<2x32xf32>, vector<2x32xf32>, vector<2x32xf32>, vector<2x32xf32>, vector<2x32xf32>, vector<2x32xf32>, vector<2x32xf32>, vector<2x32xf32> -> vector<16x32xf32>
    %cst_25 = arith.constant dense<0.000000e+00> : vector<16x8xf32>
    %176 = tpu.matmul %175, %3, %cst_25 {dimension_numbers = #tpu.dot_dimension_numbers<[1], [0], [0], [1], [0, 0, 1, 1], [], []>} : vector<16x32xf32>, vector<32x8xf32>, vector<16x8xf32> -> vector<16x8xf32>
    %177 = vector.broadcast %4 : vector<1x8xf32> to vector<16x8xf32>
    %178 = arith.addf %176, %177 : vector<16x8xf32>
    %c0_26 = arith.constant 0 : index
    %c0_27 = arith.constant 0 : index
    %179 = vector.load %arg6[%c0_26, %c0_27] : memref<16x8xf32, #tpu.memory_space<vmem>>, vector<16x8xf32>
    tpu.vector_store %arg6[%c0_26, %c0_27], %178 {strides = array<i32>} : memref<16x8xf32, #tpu.memory_space<vmem>>, vector<16x8xf32>,
    return
  }
}

</mosaic_0001>

<bundles_post_ra>
// kernel: tpu_custom_call.1
= control target key start
LH: loop header
LB: loop body
LE: loop exit
PB: predicated region body
PF: predicated region fallthrough
CT: control target
= control target key end

     0   :  { %11 = vsyncpa [#allocation3], 0  ;;  %s1671_s0 = inlined_call_operand.hbm [shape: f32[16,9], index: 0, kind: input, shape index: {}]   ;;  %s1672_s1 = inlined_call_operand.hbm [shape: f32[9,128], index: 1, kind: input, shape index: {}]   ;;  %s1673_s2 = inlined_call_operand.vmem [shape: f32[32,128], index: 2, kind: input, shape index: {}]   ;;  %s1674_s3 = inlined_call_operand.vmem [shape: f32[1,128], index: 3, kind: input, shape index: {}]   ;;  %s1675_s4 = inlined_call_operand.vmem [shape: f32[32,8], index: 4, kind: input, shape index: {}]   ;;  %s1676_s5 = inlined_call_operand.vmem [shape: f32[1,8], index: 5, kind: input, shape index: {}]   ;;  %s1677_s6 = inlined_call_operand.vmem [shape: f32[16,8], index: 6, kind: output, shape index: {}]  }
   0x1   :  { %12 = vsyncpa [#allocation5], 0  ;;  %s1415_s21 = smov [#allocation2]   ;;  %s1367_s25 = scalar_lea.hbm %s1671_s0, 256 }
   0x2   :  { %s18_s22 = sshll.u32 %s1415_s21, 4  ;;  %p1368_p0 = scmp.ne.s32.totalorder %s1671_s0, %s1367_s25  ;;  %s19_s22 = int_to_ptr.vmem [resolvable:$true] %s18_s22 }
   0x3   :  { %p1371_p1 = scmp.lt.u32.totalorder %s1367_s25, %s1671_s0 }
   0x5   :  { %p1373_p2 = pnand %p1371_p1, %p1368_p0 }
   0x7   :  { %1376 = shalt.err (!%p1373_p2)
}
   0x8   :  { %s1377_s30 = scalar_lea.vmem %s19_s22, 256  ;;  %p1382_p4 = scmp.lt.s32.totalorder %s19_s22, %s19_s22 }
   0x9   :  { %p1378_p3 = scmp.ne.s32.totalorder %s19_s22, %s1377_s30  ;;  %p1383_p5 = scmp.lt.s32.totalorder %s1377_s30, %s1377_s30 }
   0xb   :  { %p1384_p6 = por %p1383_p5, %p1382_p4 }
   0xd   :  { %p1385_p7 = pnand %p1384_p6, %p1378_p3 }
   0xf   :  { %1388 = shalt.err (!%p1385_p7)
}
  0x10   :  { %s1416_s7 = smov 128   ;;  %s1417_s8 = smov 8  }
  0x11   :  { %24 = dma.hbm_to_vmem [thread:$0]  %s1671_s0, 256, %s19_s22, [#allocation3], %s1416_s7, %s1416_s7, %s1417_s8  }
  0x12   :  { %s1418_s11 = smov [#allocation4]   ;;  %s1389_s15 = scalar_lea.hbm %s1672_s1, 256 }
  0x13   :  { %s30_s12 = sshll.u32 %s1418_s11, 4  ;;  %p1390_p8 = scmp.ne.s32.totalorder %s1672_s1, %s1389_s15  ;;  %s31_s12 = int_to_ptr.vmem [resolvable:$true] %s30_s12 }
  0x14   :  { %p1393_p9 = scmp.lt.u32.totalorder %s1389_s15, %s1672_s1 }
  0x16   :  { %p1395_p10 = pnand %p1393_p9, %p1390_p8 }
  0x18   :  { %1398 = shalt.err (!%p1395_p10)
}
  0x19   :  { %s1399_s20 = scalar_lea.vmem %s31_s12, 256  ;;  %p1404_p12 = scmp.lt.s32.totalorder %s31_s12, %s31_s12 }
  0x1a   :  { %p1400_p11 = scmp.ne.s32.totalorder %s31_s12, %s1399_s20  ;;  %p1405_p13 = scmp.lt.s32.totalorder %s1399_s20, %s1399_s20 }
  0x1c   :  { %p1406_p0 = por %p1405_p13, %p1404_p12 }
  0x1e   :  { %p1407_p1 = pnand %p1406_p0, %p1400_p11 }
  0x20   :  { %1410 = shalt.err (!%p1407_p1)
}
  0x21   :  { %36 = dma.hbm_to_vmem [thread:$0]  %s1672_s1, 256, %s31_s12, [#allocation5], %s1416_s7, %s1416_s7, %s1417_s8  }
  0x22   :  { %1411 = dma.done.wait [#allocation3], 256  }
  0x23   :  { %1412 = vsyncadd [#allocation3], 4294967040 }
  0x24   :  { %1413 = dma.done.wait [#allocation5], 256  }
  0x25   :  { %1414 = vsyncadd [#allocation5], 4294967040  ;;  %v1419_v0 = vmov 0.0|0.0   ;;  %vm1420_vm0 = vmmov 0   ;;  %v1421_v1 = vmov 0.0   ;;  %vm78_vm1 = vcmask 1040384  }
  0x26   :  { %1268 = vmatprep.subr.bf16.mxu1 %v1419_v0  ;;  %1171 = vmatprep.mubr.msk.f32.mxu1 %vm1420_vm0, %v1421_v1  ;;  %vm1422_vm2 = vmmov 1   ;;  %vm71_vm4 = vcmask 72704   ;;  %v51_v2 = vld [vmem:[#allocation4] sm:$0xff]  ;;  %v52_v3 = vld [vmem:[#allocation4 + $0x8] sm:$0x1]  ;;  %v53_v4 = vld [vmem:[%s1673_s2] sm:$0xff]  ;;  %v157_v13 = vlaneseq }
  0x27   :  { %vm1263_vm3 = vmpackc.low %vm78_vm1, %vm1422_vm2  ;;  %v1262_v5 = vpack.c.bf16 %v52_v3, %v51_v2  ;;  %v54_v6 = vld [vmem:[%s1673_s2 + $0x8] sm:$0xff]  ;;  %v63_v7 = vld [vmem:[#allocation2] sm:$0xff]  ;;  %v1423_v20 = vmov 0.5   ;;  %s1425_s30 = smov 32   ;;  %vm164_vm8 = vcmask 261120   ;;  %vm983_vm9 = vcmask 1041408  }
  0x28   :  { %v1494_v8 = vpack.c.bf16 %v54_v6, %v53_v4  ;;  %1160 = vmatprep.mubr.msk.f32.mxu0 %vm71_vm4, %v63_v7  ;;  %v55_v9 = vld [vmem:[%s1673_s2 + $0x10] sm:$0xff]  ;;  %v56_v10 = vld [vmem:[%s1673_s2 + $0x18] sm:$0xff]  ;;  %v64_v11 = vld [vmem:[#allocation2 + $0x8] sm:$0xff]  ;;  %v158_v14 = vand.u32 127, %v157_v13  ;;  %vm985_vm10 = vcmask 1043456   ;;  %vm987_vm11 = vcmask 1045504  }
  0x29   :  { %1264 = vmatprep.subr.msk.bf16.mxu0 %vm1263_vm3, %v1262_v5  ;;  %v1504_v12 = vpack.c.bf16 %v56_v10, %v55_v9  ;;  %v1092_v15 = vld [vmem:[%s1674_s3] ss:$0 sm:$0xff]  ;;  %s1424_s3 = smov 64   ;;  %vm1083_vm12 = vcmask 64512  }
  0x2a   :  { %1270 = vmatpush3.bf16.msra.mxu1 %v1494_v8  ;;  %1267 = vmatpush3.bf16.msk.msra.mxu0 %vm1263_vm3, %v1262_v5  ;;  %vm159_vm5 = vcmp.ge.s32.totalorder %v158_v14, 64  ;;  %vm160_vm6 = vcmp.lt.s32.totalorder %v158_v14, 96 }
  0x2b   :  { %1271 = vmatprep.subr.bf16.mxu1 %v1419_v0  ;;  %1274 = vmatprep.subr.bf16.mxu0 %v1419_v0  ;;  %vm161_vm7 = vmand %vm159_vm5, %vm160_vm6 }
  0x2c   :  { %v1531_v21 = vsel %vm161_vm7, 1.0, %v1423_v20  ;;  %v1535_v27 = vsel %vm161_vm7, 0.0, %v1423_v20 }
  0x2d   :  { %1161 = vmatmul.mubr.msk.f32.vlgmr.msra.gmra.mrb[0].mxu0 %vm71_vm4, %v64_v11 }
  0x2e   :  { %1273 = vmatpush3.bf16.msra.mxu1 %v1504_v12  ;;  %1276 = vmatpush3.bf16.msra.mxu0 %v1494_v8 }
  0x2f   :  { %1277 = vmatprep.subr.bf16.mxu0 %v1419_v0  ;;  %1182 = vmatprep.mubr.msk.f32.mxu0 %vm1420_vm0, %v1421_v1 }
  0x30   :  { %1280 = vmatprep.subr.bf16.mxu1 %v1419_v0 }
  0x31   :  { %1172 = vmatmul.mubr.f32.vlgmr.msra.gmra.mrb[0].mxu1 %v1421_v1 }
  0x32   :  { %1279 = vmatpush3.bf16.msra.mxu0 %v1504_v12  ;;  %1282 = vmatpush3.bf16.msra.mxu1 %v1494_v8 }
  0x33   :  { %1283 = vmatprep.subr.bf16.mxu1 %v1419_v0  ;;  %1193 = vmatprep.mubr.msk.f32.mxu1 %vm1420_vm0, %v1421_v1 }
  0x34   :  { %1286 = vmatprep.subr.bf16.mxu0 %v1419_v0 }
  0x36   :  { %1285 = vmatpush3.bf16.msra.mxu1 %v1504_v12 }
  0x37   :  { %1292 = vmatprep.subr.bf16.mxu1 %v1419_v0 }
 0x100   :  { %v1162_v16 = vpop.f32.mrb[0].mxu0 }
 0x101   :  { %v1527_v17 = vadd.f32 %v1162_v16, %v1092_v15  ;;  %v148_v18 = vpop.f32.mrb[1].mxu0 }
 0x102   :  { %v1529_v19 = vadd.f32 %v1092_v15, %v148_v18 }
 0x104   :  { %v234_v22 = vpop.f32.mrb[0].mxu1 }
 0x105   :  { %v238_v23 = vadd.f32 %v234_v22, %v1529_v19  ;;  %v1173_v24 = vpop.f32.mrb[1].mxu1 }
 0x107   :  { %v239_v25 = vmul.f32 %v238_v23, %v1531_v21 }
 0x109   :  { %1335 = vtanh.f32 %v239_v25 }
 0x113   :  { %v1336_v26 = vpop.eup %1335 }
 0x114   :  { %v241_v28 = vmul.f32 %v1336_v26, %v1531_v21 }
 0x116   :  { %v242_v29 = vadd.f32 %v241_v28, %v1535_v27 }
 0x118   :  { %245 = vrot.lane.b32.xlu0 %v242_v29, %s1424_s3  ;;  %v243_v32 = vmul.f32 0.0, %v242_v29 }
 0x18a   :  { %v246_v30 = vpop.permute.xlu0 %245 }
 0x18b   :  { %v248_v31 = vmul.f32 %v246_v30, %v242_v29 }
 0x18d   :  { %250 = vrot.lane.b32.xlu0 %v248_v31, %s1425_s30 }
 0x1ff   :  { %v251_v33 = vpop.permute.xlu0 %250 }
 0x200   :  { %v253_v34 = vadd.f32 %v251_v33, %v243_v32 }
 0x202   :  { %1337 = vtanh.f32 %v253_v34  ;;  %v344_v49 = vrot.slane %v253_v34, 6 }
 0x20c   :  { %v1338_v35 = vpop.eup %1337 }
 0x20d   :  { %256 = vrot.lane.b32.xlu1 %v1338_v35, %s1424_s3 }
 0x27f   :  { %v257_v36 = vpop.permute.xlu1 %256 }
 0x280   :  { %v1542_v37 = vmul.f32 %v257_v36, %v242_v29 }
 0x282   :  { %261 = vrot.lane.b32.xlu1 %v1542_v37, %s1425_s30 }
 0x2f4   :  { %v262_v38 = vpop.permute.xlu1 %261 }
 0x2f5   :  { %1183 = vmatmul.mubr.msk.f32.vlgmr.msra.gmra.mrb[2].mxu0 %vm164_vm8, %v262_v38 }
 0x2f6   :  { %1288 = vmatpush3.bf16.msra.mxu0 %v1494_v8  ;;  %1204 = vmatprep.mubr.msk.f32.mxu0 %vm1420_vm0, %v1421_v1 }
 0x2f7   :  { %1289 = vmatprep.subr.bf16.mxu0 %v1419_v0 }
 0x2fa   :  { %1291 = vmatpush3.bf16.msra.mxu0 %v1504_v12 }
 0x2fb   :  { %1298 = vmatprep.subr.bf16.mxu0 %v1419_v0 }
 0x3c8   :  { %v331_v39 = vpop.f32.mrb[2].mxu0 }
 0x3c9   :  { %v336_v40 = vrot.slane %v331_v39, 6  ;;  %v1184_v41 = vpop.f32.mrb[3].mxu0 }
 0x3cb   :  { %v338_v42 = vadd.f32 %v336_v40, %v1529_v19 }
 0x3cd   :  { %v339_v43 = vmul.f32 %v338_v42, %v1531_v21 }
 0x3cf   :  { %1339 = vtanh.f32 %v339_v43 }
 0x3d9   :  { %v1340_v44 = vpop.eup %1339 }
 0x3da   :  { %v341_v45 = vmul.f32 %v1340_v44, %v1531_v21 }
 0x3dc   :  { %v342_v46 = vadd.f32 %v341_v45, %v1535_v27 }
 0x3de   :  { %348 = vrot.lane.b32.xlu0 %v342_v46, %s1424_s3  ;;  %v346_v50 = vmul.f32 %v344_v49, %v342_v46 }
 0x450   :  { %v349_v47 = vpop.permute.xlu0 %348 }
 0x451   :  { %v351_v48 = vmul.f32 %v349_v47, %v342_v46 }
 0x453   :  { %353 = vrot.lane.b32.xlu1 %v351_v48, %s1425_s30 }
 0x4c5   :  { %v354_v51 = vpop.permute.xlu1 %353 }
 0x4c6   :  { %v356_v52 = vadd.f32 %v354_v51, %v346_v50 }
 0x4c8   :  { %1341 = vtanh.f32 %v356_v52  ;;  %v448_v6 = vrot.slane %v356_v52, 6 }
 0x4d2   :  { %v1342_v53 = vpop.eup %1341 }
 0x4d3   :  { %359 = vrot.lane.b32.xlu0 %v1342_v53, %s1424_s3 }
 0x545   :  { %v360_v54 = vpop.permute.xlu0 %359 }
 0x546   :  { %v362_v55 = vmul.f32 %v360_v54, %v342_v46 }
 0x548   :  { %v364_v56 = vrot.slane %v362_v55, 2  ;;  %v984_v15 = vsel %vm983_vm9, %v1542_v37, %v362_v55 }
 0x54a   :  { %365 = vrot.lane.b32.xlu1 %v364_v56, %s1425_s30 }
 0x5bc   :  { %v366_v57 = vpop.permute.xlu1 %365 }
 0x5bd   :  { %1194 = vmatmul.mubr.msk.f32.vlgmr.msra.gmra.mrb[2].mxu1 %vm164_vm8, %v366_v57 }
 0x5be   :  { %1294 = vmatpush3.bf16.msra.mxu1 %v1494_v8  ;;  %1215 = vmatprep.mubr.msk.f32.mxu1 %vm1420_vm0, %v1421_v1 }
 0x5bf   :  { %1295 = vmatprep.subr.bf16.mxu1 %v1419_v0 }
 0x5c2   :  { %1297 = vmatpush3.bf16.msra.mxu1 %v1504_v12 }
 0x5c3   :  { %1304 = vmatprep.subr.bf16.mxu1 %v1419_v0 }
 0x690   :  { %v435_v58 = vpop.f32.mrb[2].mxu1 }
 0x691   :  { %v440_v59 = vrot.slane %v435_v58, 4  ;;  %v1195_v60 = vpop.f32.mrb[3].mxu1 }
 0x693   :  { %v442_v61 = vadd.f32 %v440_v59, %v1529_v19 }
 0x695   :  { %v443_v62 = vmul.f32 %v442_v61, %v1531_v21 }
 0x697   :  { %1343 = vtanh.f32 %v443_v62 }
 0x6a1   :  { %v1344_v63 = vpop.eup %1343 }
 0x6a2   :  { %v445_v2 = vmul.f32 %v1344_v63, %v1531_v21 }
 0x6a4   :  { %v446_v3 = vadd.f32 %v445_v2, %v1535_v27 }
 0x6a6   :  { %452 = vrot.lane.b32.xlu0 %v446_v3, %s1424_s3  ;;  %v450_v7 = vmul.f32 %v448_v6, %v446_v3 }
 0x718   :  { %v453_v4 = vpop.permute.xlu0 %452 }
 0x719   :  { %v455_v5 = vmul.f32 %v453_v4, %v446_v3 }
 0x71b   :  { %457 = vrot.lane.b32.xlu1 %v455_v5, %s1425_s30 }
 0x78d   :  { %v458_v9 = vpop.permute.xlu1 %457 }
 0x78e   :  { %v460_v10 = vadd.f32 %v458_v9, %v450_v7 }
 0x790   :  { %1345 = vtanh.f32 %v460_v10  ;;  %v552_v33 = vrot.slane %v460_v10, 6 }
 0x79a   :  { %v1346_v11 = vpop.eup %1345 }
 0x79b   :  { %463 = vrot.lane.b32.xlu0 %v1346_v11, %s1424_s3 }
 0x80d   :  { %v464_v13 = vpop.permute.xlu0 %463 }
 0x80e   :  { %v466_v14 = vmul.f32 %v464_v13, %v446_v3 }
 0x810   :  { %v468_v16 = vrot.slane %v466_v14, 4  ;;  %v986_v18 = vsel %vm985_vm10, %v984_v15, %v466_v14 }
 0x812   :  { %469 = vrot.lane.b32.xlu1 %v468_v16, %s1425_s30 }
 0x884   :  { %v470_v20 = vpop.permute.xlu1 %469 }
 0x885   :  { %1205 = vmatmul.mubr.msk.f32.vlgmr.msra.gmra.mrb[4].mxu0 %vm164_vm8, %v470_v20 }
 0x886   :  { %1300 = vmatpush3.bf16.msra.mxu0 %v1494_v8  ;;  %1226 = vmatprep.mubr.msk.f32.mxu0 %vm1420_vm0, %v1421_v1 }
 0x887   :  { %1301 = vmatprep.subr.bf16.mxu0 %v1419_v0 }
 0x88a   :  { %1303 = vmatpush3.bf16.msra.mxu0 %v1504_v12 }
 0x88b   :  { %1310 = vmatprep.subr.bf16.mxu0 %v1419_v0 }
 0x958   :  { %v539_v22 = vpop.f32.mrb[4].mxu0 }
 0x959   :  { %v544_v23 = vrot.slane %v539_v22, 2  ;;  %v1206_v24 = vpop.f32.mrb[5].mxu0 }
 0x95b   :  { %v546_v25 = vadd.f32 %v544_v23, %v1529_v19 }
 0x95d   :  { %v547_v26 = vmul.f32 %v546_v25, %v1531_v21 }
 0x95f   :  { %1347 = vtanh.f32 %v547_v26 }
 0x969   :  { %v1348_v28 = vpop.eup %1347 }
 0x96a   :  { %v549_v29 = vmul.f32 %v1348_v28, %v1531_v21 }
 0x96c   :  { %v550_v30 = vadd.f32 %v549_v29, %v1535_v27 }
 0x96e   :  { %556 = vrot.lane.b32.xlu0 %v550_v30, %s1424_s3  ;;  %v554_v34 = vmul.f32 %v552_v33, %v550_v30 }
 0x9e0   :  { %v557_v31 = vpop.permute.xlu0 %556 }
 0x9e1   :  { %v559_v32 = vmul.f32 %v557_v31, %v550_v30 }
 0x9e3   :  { %561 = vrot.lane.b32.xlu1 %v559_v32, %s1425_s30 }
 0xa55   :  { %v562_v35 = vpop.permute.xlu1 %561 }
 0xa56   :  { %v564_v36 = vadd.f32 %v562_v35, %v554_v34 }
 0xa58   :  { %1349 = vtanh.f32 %v564_v36  ;;  %v653_v51 = vrot.slane %v564_v36, 6 }
 0xa62   :  { %v1350_v19 = vpop.eup %1349 }
 0xa63   :  { %567 = vrot.lane.b32.xlu0 %v1350_v19, %s1424_s3 }
 0xad5   :  { %v568_v37 = vpop.permute.xlu0 %567 }
 0xad6   :  { %v570_v38 = vmul.f32 %v568_v37, %v550_v30 }
 0xad8   :  { %v572_v39 = vrot.slane %v570_v38, 6  ;;  %v1594_v40 = vsel %vm987_vm11, %v986_v18, %v570_v38 }
 0xada   :  { %573 = vrot.lane.b32.xlu1 %v572_v39, %s1425_s30 }
 0xb4c   :  { %v574_v41 = vpop.permute.xlu1 %573 }
 0xb4d   :  { %1216 = vmatmul.mubr.msk.f32.vlgmr.msra.gmra.mrb[4].mxu1 %vm164_vm8, %v574_v41 }
 0xb4e   :  { %1306 = vmatpush3.bf16.msra.mxu1 %v1494_v8  ;;  %1237 = vmatprep.mubr.msk.f32.mxu1 %vm1420_vm0, %v1421_v1 }
 0xb4f   :  { %1307 = vmatprep.subr.bf16.mxu1 %v1419_v0 }
 0xb52   :  { %1309 = vmatpush3.bf16.msra.mxu1 %v1504_v12 }
 0xc20   :  { %v643_v42 = vpop.f32.mrb[4].mxu1 }
 0xc21   :  { %v647_v43 = vadd.f32 %v643_v42, %v1527_v17  ;;  %v1217_v44 = vpop.f32.mrb[5].mxu1 }
 0xc23   :  { %v648_v45 = vmul.f32 %v647_v43, %v1531_v21 }
 0xc25   :  { %1351 = vtanh.f32 %v648_v45 }
 0xc2f   :  { %v1352_v46 = vpop.eup %1351 }
 0xc30   :  { %v650_v47 = vmul.f32 %v1352_v46, %v1531_v21 }
 0xc32   :  { %v651_v48 = vadd.f32 %v650_v47, %v1535_v27 }
 0xc34   :  { %657 = vrot.lane.b32.xlu0 %v651_v48, %s1424_s3  ;;  %v655_v52 = vmul.f32 %v653_v51, %v651_v48 }
 0xca6   :  { %v658_v49 = vpop.permute.xlu0 %657 }
 0xca7   :  { %v660_v50 = vmul.f32 %v658_v49, %v651_v48 }
 0xca9   :  { %662 = vrot.lane.b32.xlu1 %v660_v50, %s1425_s30 }
 0xd1b   :  { %v663_v53 = vpop.permute.xlu1 %662 }
 0xd1c   :  { %v665_v54 = vadd.f32 %v663_v53, %v655_v52  ;;  %v60_v53 = vld [vmem:[%s1675_s4 + $0x10] sm:$0xff] }
 0xd1e   :  { %1353 = vtanh.f32 %v665_v54 }
 0xd28   :  { %v1354_v55 = vpop.eup %1353 }
 0xd29   :  { %668 = vrot.lane.b32.xlu0 %v1354_v55, %s1424_s3 }
 0xd9b   :  { %v669_v56 = vpop.permute.xlu0 %668 }
 0xd9c   :  { %v671_v57 = vmul.f32 %v669_v56, %v651_v48 }
 0xd9e   :  { %673 = vrot.lane.b32.xlu1 %v671_v57, %s1425_s30 }
 0xe10   :  { %v674_v58 = vpop.permute.xlu1 %673 }
 0xe11   :  { %1227 = vmatmul.mubr.msk.f32.vlgmr.msra.gmra.mrb[6].mxu0 %vm164_vm8, %v674_v58 }
 0xe12   :  { %1312 = vmatpush3.bf16.msra.mxu0 %v1494_v8  ;;  %1248 = vmatprep.mubr.msk.f32.mxu0 %vm1420_vm0, %v1421_v1 }
 0xe13   :  { %1313 = vmatprep.subr.bf16.mxu0 %v1419_v0  ;;  %v756_v0 = vrot.slane %v665_v54, 6  ;;  %v61_v54 = vld [vmem:[%s1675_s4 + $0x18] sm:$0xff] }
 0xe14   :  { %v1320_v55 = vpack.c.bf16 %v61_v54, %v60_v53 }
 0xe16   :  { %1315 = vmatpush3.bf16.msra.mxu0 %v1504_v12 }
 0xee4   :  { %v743_v59 = vpop.f32.mrb[6].mxu0 }
 0xee5   :  { %v748_v60 = vrot.slane %v743_v59, 6  ;;  %v1228_v61 = vpop.f32.mrb[7].mxu0 }
 0xee6   :  { %v1103_v61 = vld [vmem:[%s1676_s5] ss:$0 sm:$0xff] }
 0xee7   :  { %v750_v62 = vadd.f32 %v748_v60, %v1527_v17 }
 0xee9   :  { %v751_v63 = vmul.f32 %v750_v62, %v1531_v21 }
 0xeeb   :  { %1355 = vtanh.f32 %v751_v63 }
 0xef5   :  { %v1356_v2 = vpop.eup %1355 }
 0xef6   :  { %v753_v3 = vmul.f32 %v1356_v2, %v1531_v21 }
 0xef8   :  { %v754_v8 = vadd.f32 %v753_v3, %v1535_v27 }
 0xefa   :  { %760 = vrot.lane.b32.xlu0 %v754_v8, %s1424_s3  ;;  %v758_v12 = vmul.f32 %v756_v0, %v754_v8 }
 0xf6c   :  { %v761_v1 = vpop.permute.xlu0 %760 }
 0xf6d   :  { %v763_v4 = vmul.f32 %v761_v1, %v754_v8 }
 0xf6f   :  { %765 = vrot.lane.b32.xlu1 %v763_v4, %s1425_s30 }
 0xfe1   :  { %v766_v5 = vpop.permute.xlu1 %765 }
 0xfe2   :  { %v768_v6 = vadd.f32 %v766_v5, %v758_v12 }
 0xfe4   :  { %1357 = vtanh.f32 %v768_v6  ;;  %v860_v28 = vrot.slane %v768_v6, 6 }
 0xfee   :  { %v1358_v7 = vpop.eup %1357 }
 0xfef   :  { %771 = vrot.lane.b32.xlu0 %v1358_v7, %s1424_s3 }
0x1061   :  { %v772_v9 = vpop.permute.xlu0 %771 }
0x1062   :  { %v774_v10 = vmul.f32 %v772_v9, %v754_v8 }
0x1064   :  { %v776_v11 = vrot.slane %v774_v10, 2  ;;  %v989_v35 = vsel %vm983_vm9, %v671_v57, %v774_v10 }
0x1066   :  { %777 = vrot.lane.b32.xlu1 %v776_v11, %s1425_s30 }
0x10d8   :  { %v778_v13 = vpop.permute.xlu1 %777 }
0x10d9   :  { %1238 = vmatmul.mubr.msk.f32.vlgmr.msra.gmra.mrb[6].mxu1 %vm164_vm8, %v778_v13 }
0x11ac   :  { %v847_v14 = vpop.f32.mrb[6].mxu1 }
0x11ad   :  { %v852_v15 = vrot.slane %v847_v14, 4  ;;  %v1239_v16 = vpop.f32.mrb[7].mxu1 }
0x11af   :  { %v854_v18 = vadd.f32 %v852_v15, %v1527_v17 }
0x11b1   :  { %v855_v20 = vmul.f32 %v854_v18, %v1531_v21 }
0x11b3   :  { %1359 = vtanh.f32 %v855_v20 }
0x11bd   :  { %v1360_v22 = vpop.eup %1359 }
0x11be   :  { %v857_v23 = vmul.f32 %v1360_v22, %v1531_v21 }
0x11c0   :  { %v858_v24 = vadd.f32 %v857_v23, %v1535_v27 }
0x11c2   :  { %864 = vrot.lane.b32.xlu0 %v858_v24, %s1424_s3  ;;  %v862_v29 = vmul.f32 %v860_v28, %v858_v24 }
0x1234   :  { %v865_v25 = vpop.permute.xlu0 %864 }
0x1235   :  { %v867_v26 = vmul.f32 %v865_v25, %v858_v24 }
0x1237   :  { %869 = vrot.lane.b32.xlu1 %v867_v26, %s1425_s30 }
0x12a9   :  { %v870_v30 = vpop.permute.xlu1 %869 }
0x12aa   :  { %v872_v31 = vadd.f32 %v870_v30, %v862_v29 }
0x12ac   :  { %1361 = vtanh.f32 %v872_v31  ;;  %v964_v49 = vrot.slane %v872_v31, 6 }
0x12b6   :  { %v1362_v32 = vpop.eup %1361 }
0x12b7   :  { %875 = vrot.lane.b32.xlu0 %v1362_v32, %s1424_s3 }
0x1329   :  { %v876_v33 = vpop.permute.xlu0 %875 }
0x132a   :  { %v878_v34 = vmul.f32 %v876_v33, %v858_v24 }
0x132c   :  { %v880_v36 = vrot.slane %v878_v34, 4  ;;  %v990_v19 = vsel %vm985_vm10, %v989_v35, %v878_v34 }
0x132e   :  { %881 = vrot.lane.b32.xlu1 %v880_v36, %s1425_s30 }
0x13a0   :  { %v882_v37 = vpop.permute.xlu1 %881 }
0x13a1   :  { %1249 = vmatmul.mubr.msk.f32.vlgmr.msra.gmra.mrb[8].mxu0 %vm164_vm8, %v882_v37 }
0x1474   :  { %v951_v38 = vpop.f32.mrb[8].mxu0 }
0x1475   :  { %v956_v39 = vrot.slane %v951_v38, 2  ;;  %v1250_v41 = vpop.f32.mrb[9].mxu0 }
0x1477   :  { %v958_v42 = vadd.f32 %v956_v39, %v1527_v17 }
0x1479   :  { %v959_v43 = vmul.f32 %v958_v42, %v1531_v21 }
0x147b   :  { %1363 = vtanh.f32 %v959_v43 }
0x1485   :  { %v1364_v44 = vpop.eup %1363 }
0x1486   :  { %v961_v45 = vmul.f32 %v1364_v44, %v1531_v21  ;;  %v58_v21 = vld [vmem:[%s1675_s4] sm:$0xff] }
0x1488   :  { %v962_v46 = vadd.f32 %v961_v45, %v1535_v27  ;;  %v59_v27 = vld [vmem:[%s1675_s4 + $0x8] sm:$0xff] }
0x148a   :  { %968 = vrot.lane.b32.xlu0 %v962_v46, %s1424_s3  ;;  %v966_v50 = vmul.f32 %v964_v49, %v962_v46 }
0x14fc   :  { %v969_v47 = vpop.permute.xlu0 %968 }
0x14fd   :  { %v971_v48 = vmul.f32 %v969_v47, %v962_v46 }
0x14ff   :  { %973 = vrot.lane.b32.xlu1 %v971_v48, %s1425_s30 }
0x1503   :  { %1000 = vrot.lane.b32.xlu1 %v1594_v40, %s1425_s30  ;;  %v1316_v40 = vpack.c.bf16 %v59_v27, %v58_v21 }
0x1505   :  { %1317 = vmatprep.subr.bf16.mxu1 %v1316_v40 }
0x1506   :  { %1319 = vmatpush3.bf16.msra.mxu1 %v1316_v40 }
0x1507   :  { %1321 = vmatprep.subr.bf16.mxu1 %v1320_v55 }
0x150a   :  { %1323 = vmatpush3.bf16.msra.mxu1 %v1320_v55 }
0x1571   :  { %v974_v17 = vpop.permute.xlu1 %973 }
0x1572   :  { %v976_v51 = vadd.f32 %v974_v17, %v966_v50 }
0x1574   :  { %1365 = vtanh.f32 %v976_v51 }
0x1575   :  { %v1001_v52 = vpop.permute.xlu1 %1000 }
0x1576   :  { %1259 = vmatprep.mubr.msk.f32.mxu1 %vm164_vm8, %v1001_v52 }
0x157e   :  { %v1366_v56 = vpop.eup %1365 }
0x157f   :  { %979 = vrot.lane.b32.xlu0 %v1366_v56, %s1424_s3 }
0x15f1   :  { %v980_v57 = vpop.permute.xlu0 %979 }
0x15f2   :  { %v982_v58 = vmul.f32 %v980_v57, %v962_v46 }
0x15f4   :  { %v991_v59 = vsel %vm987_vm11, %v990_v19, %v982_v58 }
0x15f5   :  { %1002 = vrot.lane.b32.xlu0 %v991_v59, %s1425_s30 }
0x1667   :  { %v1003_v60 = vpop.permute.xlu0 %1002 }
0x1668   :  { %1260 = vmatmul.mubr.msk.f32.vlgmr.msra.gmra.mrb[8].mxu1 %vm164_vm8, %v1003_v60 }
0x173b   :  { %v1261_v62 = vpop.f32.mrb[8].mxu1 }
0x173c   :  { %v1080_v63 = vadd.f32 %v1261_v62, %v1103_v61  ;;  %v1074_v2 = vpop.f32.mrb[9].mxu1 }
0x173d   :  { %v1075_v3 = vadd.f32 %v1103_v61, %v1074_v2 }
0x173e   :  { %1085 = vst.msk [vmem:[%s1677_s6 + $0x8] sm:$0xff] %vm1083_vm12, %v1080_v63 }
0x173f   :  { %1084 = vst.msk [vmem:[%s1677_s6] sm:$0xff] %vm1083_vm12, %v1075_v3 }
0x1740   :  { %1090 = vsyncpa [#allocation3], 1 }
0x1741   :  { %1091 = vsyncpa [#allocation5], 1 }

</bundles_post_ra>
